<compile_context>
chip_gen: v7x
topology: tpu7x:2x2x1
jax: 0.10.0
libtpu: 0.0.40
codegen_flags: <defaults>
</compile_context>

<pallas_src>
import functools

import jax
import jax.numpy as jnp
from jax import lax
from jax.experimental import pallas as pl
from jax.experimental.pallas import tpu as pltpu


def particle_transition_kernel(p_ref, w1_ref, b1_ref, w2_ref, b2_ref, o_ref, *, tail):
    # p_ref: (tm, c_p) tile of rows (rows = seq_len * batch). The last grid step may
    # be a ragged edge block; `tail` (static) is rows % tm, 0 if the grid divides.
    x = p_ref[...].astype(jnp.float32)

    if tail:
        # Zero the out-of-bounds rows of the ragged last block so LN stays on clean
        # data; their output rows are discarded by Pallas' masked edge-block store.
        row = lax.broadcasted_iota(jnp.int32, x.shape, 0)
        is_last = pl.program_id(0) == pl.num_programs(0) - 1
        x = jnp.where(jnp.logical_and(is_last, row >= tail), 0.0, x)

    # LayerNorm over the feature axis (biased variance, eps matches torch 1e-5).
    # Stats stay f32; gamma/beta are pre-folded into W1/b1 in the wrapper.
    mean = jnp.mean(x, axis=-1, keepdims=True)
    var = jnp.mean((x - mean) ** 2, axis=-1, keepdims=True)
    xn = (x - mean) * lax.rsqrt(var + 1e-5)

    # Linear1 (gamma folded in) + ReLU: bf16 operands, f32 accumulation.
    h = jnp.dot(xn.astype(jnp.bfloat16), w1_ref[...],
                preferred_element_type=jnp.float32) + b1_ref[...]
    h = jnp.maximum(h, 0.0)

    # Linear2: bf16 operands, f32 accumulation.
    out = jnp.dot(h.astype(jnp.bfloat16), w2_ref[...],
                  preferred_element_type=jnp.float32) + b2_ref[...]
    o_ref[...] = out.astype(o_ref.dtype)


def _round_up(v, m):
    return ((v + m - 1) // m) * m


def particle_transition(p, gamma, beta, w1, b1, w2, b2, *, tile_rows=1024):
    """p: (seq_len, batch, c_p) -> (seq_len, batch, c_p), same dtype as p.

    w1: (c_p, hidden), w2: (hidden, c_p) -- nn.Linear weights pre-transposed to (in, out).
    """
    seq_len, batch, c_p = p.shape
    hidden = w1.shape[1]
    rows = seq_len * batch

    # Fold the LayerNorm affine into Linear1 (fold in f32, then cast to bf16 so the
    # MXU operands are bf16 while accumulation stays f32).
    w1_f = w1.astype(jnp.float32)
    w1_bf = (gamma.astype(jnp.float32).reshape(c_p, 1) * w1_f).astype(jnp.bfloat16)
    b1_f = (beta.astype(jnp.float32) @ w1_f + b1.astype(jnp.float32)).reshape(1, hidden)
    w2_bf = w2.astype(jnp.bfloat16)
    b2_f = b2.astype(jnp.float32).reshape(1, c_p)

    # Row tile: multiple of 16 (valid for f32 (8,128) and bf16 (16,128) tiling),
    # large enough to amortize the ~0.35 us/step pipeline overhead, capped so that
    # grid_m >= 2 whenever rows allows it (v7x has 2 TensorCores to feed).
    ALIGN = 16
    half = _round_up(-(-rows // 2), ALIGN)
    tm = max(ALIGN, min(_round_up(tile_rows, ALIGN), half))
    grid_m = pl.cdiv(rows, tm)
    tail = rows % tm  # static; 0 means no ragged edge block

    # Free reshape (contiguous); no dtype cast, no padding -> no extra HBM passes.
    p2d = p.reshape(rows, c_p)

    itemsize = jnp.dtype(p.dtype).itemsize
    flops = 2 * rows * c_p * hidden * 2                       # two GEMMs
    bytes_accessed = (rows * c_p * itemsize * 2               # activations in + out
                      + (c_p * hidden + hidden * c_p) * 2     # bf16 weights
                      + (hidden + c_p) * 4)                   # folded biases

    kernel = functools.partial(particle_transition_kernel, tail=tail)

    # NOTE: if rows is ever too small to raise tm (grid stuck at 2-4 tiny steps),
    # pipeline_mode=pl.Buffered(3) on the row-tile specs is the next knob to try.
    out2d = pl.pallas_call(
        kernel,
        out_shape=jax.ShapeDtypeStruct((rows, c_p), p.dtype),
        grid=(grid_m,),
        in_specs=[
            pl.BlockSpec((tm, c_p), lambda i: (i, 0)),       # p row tile
            pl.BlockSpec((c_p, hidden), lambda i: (0, 0)),   # W1 (gamma folded, resident)
            pl.BlockSpec((1, hidden), lambda i: (0, 0)),     # b1 (beta folded, resident)
            pl.BlockSpec((hidden, c_p), lambda i: (0, 0)),   # W2 (resident)
            pl.BlockSpec((1, c_p), lambda i: (0, 0)),        # b2 (resident)
        ],
        out_specs=pl.BlockSpec((tm, c_p), lambda i: (i, 0)),
        compiler_params=pltpu.CompilerParams(
            dimension_semantics=("parallel",)),
        cost_estimate=pl.CostEstimate(
            flops=flops, transcendentals=rows, bytes_accessed=bytes_accessed),
    )(p2d, w1_bf, b1_f, w2_bf, b2_f)

    return out2d.reshape(seq_len, batch, c_p)


def reference(p, gamma, beta, w1, b1, w2, b2):
    x = p.astype(jnp.float32)
    mean = jnp.mean(x, axis=-1, keepdims=True)
    var = jnp.mean((x - mean) ** 2, axis=-1, keepdims=True)
    xn = (x - mean) * lax.rsqrt(var + 1e-5) * gamma + beta
    h = jnp.maximum(xn @ w1 + b1, 0.0)
    return (h @ w2 + b2).astype(jnp.float32)


if __name__ == "__main__":
    # Module config: c_p = 32, factor = 4 -> hidden = 128
    seq_len, batch, c_p, factor = 16, 6, 32, 4
    hidden = c_p * factor

    key = jax.random.PRNGKey(0)
    k_p, k_g, k_b, k_w1, k_b1, k_w2, k_b2 = jax.random.split(key, 7)

    p = jax.random.normal(k_p, (seq_len, batch, c_p), dtype=jnp.float32)

    # Deterministic synthetic parameters (shapes match nn.LayerNorm / nn.Linear).
    gamma = 1.0 + 0.1 * jax.random.normal(k_g, (c_p,), dtype=jnp.float32)
    beta = 0.1 * jax.random.normal(k_b, (c_p,), dtype=jnp.float32)
    # nn.Linear stores weight as (out, in); pre-transposed here to (in, out).
    w1 = 0.05 * jax.random.normal(k_w1, (c_p, hidden), dtype=jnp.float32)
    b1 = 0.05 * jax.random.normal(k_b1, (hidden,), dtype=jnp.float32)
    w2 = 0.05 * jax.random.normal(k_w2, (hidden, c_p), dtype=jnp.float32)
    b2 = 0.05 * jax.random.normal(k_b2, (c_p,), dtype=jnp.float32)

    ref = reference(p, gamma, beta, w1, b1, w2, b2)

    # Default tiling: rows=96 -> tm=48, grid=(2,) (keeps both v7x TCs busy), tail=0.
    out_a = jax.block_until_ready(
        particle_transition(p, gamma, beta, w1, b1, w2, b2))
    # Smaller caller-supplied tile (rounded to 16): exercises a different grid.
    out_b = jax.block_until_ready(
        particle_transition(p, gamma, beta, w1, b1, w2, b2, tile_rows=16))

    assert out_a.shape == (seq_len, batch, c_p)
    # bf16 matmul operands with f32 accumulation -> loosened tolerance vs f32 ref.
    assert jnp.allclose(out_a, ref, atol=3e-2, rtol=3e-2), "mismatch vs reference (default tile)"
    assert jnp.allclose(out_b, ref, atol=3e-2, rtol=3e-2), "mismatch vs reference (small tile)"
    # Tiling must not change the math.
    assert jnp.allclose(out_a, out_b, atol=1e-5, rtol=1e-5), "tiling-dependent result"

    # Ragged row count: rows=42 -> tm=32, grid=(2,), tail=10 -> exercises the
    # in-kernel tail mask and Pallas' masked edge block (no wrapper padding).
    p_r = jax.random.normal(k_p, (7, 6, c_p), dtype=jnp.float32)
    ref_r = reference(p_r, gamma, beta, w1, b1, w2, b2)
    out_r = jax.block_until_ready(
        particle_transition(p_r, gamma, beta, w1, b1, w2, b2))
    assert out_r.shape == (7, 6, c_p)
    assert jnp.allclose(out_r, ref_r, atol=3e-2, rtol=3e-2), "mismatch vs reference (ragged rows)"

    # bf16 activations at the call boundary (halves activation HBM traffic on
    # the memory-bound v6e/v7x path); LN stats stay f32 inside the kernel.
    p_bf = p.astype(jnp.bfloat16)
    out_bf = jax.block_until_ready(
        particle_transition(p_bf, gamma, beta, w1, b1, w2, b2))
    assert out_bf.dtype == jnp.bfloat16
    assert jnp.allclose(out_bf.astype(jnp.float32), ref, atol=6e-2, rtol=6e-2), \
        "mismatch vs reference (bf16 I/O)"

    print("KERNEL_OK")
</pallas_src>

<mosaic_0001>
module attributes {stable_mosaic.version = 11 : i64} {
  func.func @particle_transition_kernel(%arg0: i32, %arg1: memref<48x32xf32, #tpu.memory_space<vmem>>, %arg2: memref<32x128xbf16, #tpu.memory_space<vmem>>, %arg3: memref<1x128xf32, #tpu.memory_space<vmem>>, %arg4: memref<128x32xbf16, #tpu.memory_space<vmem>>, %arg5: memref<1x32xf32, #tpu.memory_space<vmem>>, %arg6: memref<48x32xf32, #tpu.memory_space<vmem>>) attributes {dimension_semantics = [#tpu.dimension_semantics<parallel>], iteration_bounds = array<i64: 2>, scalar_prefetch = 0 : i64, scratch_operands = 0 : i64, tpu.core_type = #tpu.core_type<tc>, window_params = [{transform_indices = @transform_0, window_bounds = array<i64: 48, 32>}, {pipeline_mode = #tpu.pipeline_mode<synchronous>, transform_indices = @transform_1, window_bounds = array<i64: 32, 128>}, {pipeline_mode = #tpu.pipeline_mode<synchronous>, transform_indices = @transform_2, window_bounds = array<i64: 1, 128>}, {pipeline_mode = #tpu.pipeline_mode<synchronous>, transform_indices = @transform_3, window_bounds = array<i64: 128, 32>}, {pipeline_mode = #tpu.pipeline_mode<synchronous>, transform_indices = @transform_4, window_bounds = array<i64: 1, 32>}, {transform_indices = @transform_5, window_bounds = array<i64: 48, 32>}]} {
    %c0 = arith.constant 0 : index
    %c0_0 = arith.constant 0 : index
    %0 = vector.load %arg1[%c0, %c0_0] : memref<48x32xf32, #tpu.memory_space<vmem>>, vector<48x32xf32>
    %cst = arith.constant dense<0.000000e+00> : vector<48xf32>
    %1 = vector.multi_reduction <add>, %0, %cst [1] : vector<48x32xf32> to vector<48xf32>
    %2 = vector.shape_cast %1 : vector<48xf32> to vector<48x1xf32>
    %cst_1 = arith.constant 3.200000e+01 : f32
    %3 = vector.broadcast %cst_1 : f32 to vector<48x1xf32>
    %4 = arith.divf %2, %3 : vector<48x1xf32>
    %5 = vector.broadcast %4 : vector<48x1xf32> to vector<48x32xf32>
    %6 = arith.subf %0, %5 : vector<48x32xf32>
    %7 = arith.mulf %6, %6 : vector<48x32xf32>
    %cst_2 = arith.constant dense<0.000000e+00> : vector<48xf32>
    %8 = vector.multi_reduction <add>, %7, %cst_2 [1] : vector<48x32xf32> to vector<48xf32>
    %9 = vector.shape_cast %8 : vector<48xf32> to vector<48x1xf32>
    %cst_3 = arith.constant 3.200000e+01 : f32
    %10 = vector.broadcast %cst_3 : f32 to vector<48x1xf32>
    %11 = arith.divf %9, %10 : vector<48x1xf32>
    %12 = vector.broadcast %4 : vector<48x1xf32> to vector<48x32xf32>
    %13 = arith.subf %0, %12 : vector<48x32xf32>
    %cst_4 = arith.constant 9.99999974E-6 : f32
    %14 = vector.broadcast %cst_4 : f32 to vector<48x1xf32>
    %15 = arith.addf %11, %14 : vector<48x1xf32>
    %16 = math.rsqrt %15 : vector<48x1xf32>
    %17 = vector.broadcast %16 : vector<48x1xf32> to vector<48x32xf32>
    %18 = arith.mulf %13, %17 : vector<48x32xf32>
    %19 = arith.truncf %18 : vector<48x32xf32> to vector<48x32xbf16>
    %c0_5 = arith.constant 0 : index
    %c0_6 = arith.constant 0 : index
    %20 = vector.load %arg2[%c0_5, %c0_6] : memref<32x128xbf16, #tpu.memory_space<vmem>>, vector<32x128xbf16>
    %cst_7 = arith.constant dense<0.000000e+00> : vector<48x128xf32>
    %21 = tpu.matmul %19, %20, %cst_7 {dimension_numbers = #tpu.dot_dimension_numbers<[1], [0], [0], [1], [0, 0, 1, 1], [], []>} : vector<48x32xbf16>, vector<32x128xbf16>, vector<48x128xf32> -> vector<48x128xf32>
    %c0_8 = arith.constant 0 : index
    %c0_9 = arith.constant 0 : index
    %22 = vector.load %arg3[%c0_8, %c0_9] : memref<1x128xf32, #tpu.memory_space<vmem>>, vector<1x128xf32>
    %23 = vector.broadcast %22 : vector<1x128xf32> to vector<48x128xf32>
    %24 = arith.addf %21, %23 : vector<48x128xf32>
    %cst_10 = arith.constant 0.000000e+00 : f32
    %25 = vector.broadcast %cst_10 : f32 to vector<48x128xf32>
    %26 = arith.maximumf %24, %25 : vector<48x128xf32>
    %27 = arith.truncf %26 : vector<48x128xf32> to vector<48x128xbf16>
    %c0_11 = arith.constant 0 : index
    %c0_12 = arith.constant 0 : index
    %28 = vector.load %arg4[%c0_11, %c0_12] : memref<128x32xbf16, #tpu.memory_space<vmem>>, vector<128x32xbf16>
    %cst_13 = arith.constant dense<0.000000e+00> : vector<48x32xf32>
    %29 = tpu.matmul %27, %28, %cst_13 {dimension_numbers = #tpu.dot_dimension_numbers<[1], [0], [0], [1], [0, 0, 1, 1], [], []>} : vector<48x128xbf16>, vector<128x32xbf16>, vector<48x32xf32> -> vector<48x32xf32>
    %c0_14 = arith.constant 0 : index
    %c0_15 = arith.constant 0 : index
    %30 = vector.load %arg5[%c0_14, %c0_15] : memref<1x32xf32, #tpu.memory_space<vmem>>, vector<1x32xf32>
    %31 = vector.broadcast %30 : vector<1x32xf32> to vector<48x32xf32>
    %32 = arith.addf %29, %31 : vector<48x32xf32>
    %c0_16 = arith.constant 0 : index
    %c0_17 = arith.constant 0 : index
    %33 = vector.load %arg6[%c0_16, %c0_17] : memref<48x32xf32, #tpu.memory_space<vmem>>, vector<48x32xf32>
    tpu.vector_store %arg6[%c0_16, %c0_17], %32 {strides = array<i32>} : memref<48x32xf32, #tpu.memory_space<vmem>>, vector<48x32xf32>,
    return
  }
  func.func @transform_0(%arg0: i32) -> (i32, i32) {
    %c0_i32 = arith.constant 0 : i32
    %c0_i32_0 = arith.constant 0 : i32
    return %arg0, %c0_i32 : i32, i32
  }
  func.func @transform_1(%arg0: i32) -> (i32, i32) {
    %c0_i32 = arith.constant 0 : i32
    %c0_i32_0 = arith.constant 0 : i32
    %c0_i32_1 = arith.constant 0 : i32
    return %c0_i32, %c0_i32_0 : i32, i32
  }
  func.func @transform_2(%arg0: i32) -> (i32, i32) {
    %c0_i32 = arith.constant 0 : i32
    %c0_i32_0 = arith.constant 0 : i32
    %c0_i32_1 = arith.constant 0 : i32
    return %c0_i32, %c0_i32_0 : i32, i32
  }
  func.func @transform_3(%arg0: i32) -> (i32, i32) {
    %c0_i32 = arith.constant 0 : i32
    %c0_i32_0 = arith.constant 0 : i32
    %c0_i32_1 = arith.constant 0 : i32
    return %c0_i32, %c0_i32_0 : i32, i32
  }
  func.func @transform_4(%arg0: i32) -> (i32, i32) {
    %c0_i32 = arith.constant 0 : i32
    %c0_i32_0 = arith.constant 0 : i32
    %c0_i32_1 = arith.constant 0 : i32
    return %c0_i32, %c0_i32_0 : i32, i32
  }
  func.func @transform_5(%arg0: i32) -> (i32, i32) {
    %c0_i32 = arith.constant 0 : i32
    %c0_i32_0 = arith.constant 0 : i32
    return %arg0, %c0_i32 : i32, i32
  }
}

</mosaic_0001>

<bundles_post_ra>
// kernel: tpu_custom_call.1
= control target key start
LH: loop header
LB: loop body
LE: loop exit
PB: predicated region body
PF: predicated region fallthrough
CT: control target
= control target key end

     0   :  { %s778_s18 = smov 0   ;;  %s919_s0 = inlined_call_operand.vmem [shape: f32[96,32], index: 0, kind: input, shape index: {}]   ;;  %s920_s1 = inlined_call_operand.vmem [shape: bf16[32,128], index: 1, kind: input, shape index: {}]   ;;  %s921_s2 = inlined_call_operand.vmem [shape: f32[1,128], index: 2, kind: input, shape index: {}]   ;;  %s922_s3 = inlined_call_operand.vmem [shape: bf16[128,32], index: 3, kind: input, shape index: {}]   ;;  %s923_s4 = inlined_call_operand.vmem [shape: f32[1,32], index: 4, kind: input, shape index: {}]   ;;  %s924_s5 = inlined_call_operand.vmem [shape: f32[96,32], index: 5, kind: output, shape index: {}]  }
   0x1 LB: > { %s606_s19 = sadd.s32 4294967295, %s744_s18   ;;  %p610_p0 = scmp.ge.s32.totalorder %s744_s18, 1  ;;  %s744_s18 = sphi %s778_s18, %s15_s18  }
   0x2   : > { %p188_p1 = scmp.lt.s32.totalorder %s744_s18, 3 }
   0x4   : > { %p189_p2 = pnand %p610_p0, %p188_p1 }
   0x5   : > { %s216_s20 = smul.u32 (!%p189_p2), 6, %s606_s19  ;;  %vm235_vm0 = vcmask (!%p189_p2), 261120   ;;  %v716_v42 = vld [vmem:[%s920_s1] sm:$0xff] (!%p189_p2)   ;;  %v746_v43 = vmov (!%p189_p2), 0.0   ;;  %v717_v44 = vld [vmem:[%s920_s1 + $0x8] sm:$0xff] (!%p189_p2)   ;;  %vm747_vm1 = vmmov (!%p189_p2), 0  }
   0x6   : > { %192 = sbr.rel (%p189_p2) target bundleno = 785 (0x311), region = 40  ;;  %646 = vmatprep.subr.bf16.mxu0 (!%p189_p2), %v746_v43  ;;  %690 = vmatprep.subr.bf16.mxu1 (!%p189_p2), %v746_v43  ;;  %v718_v45 = vld [vmem:[%s922_s3] sm:$0xff] (!%p189_p2)   ;;  %v719_v46 = vld [vmem:[%s922_s3 + $0x8] sm:$0xff] (!%p189_p2)   ;;  %v720_v47 = vld [vmem:[%s922_s3 + $0x10] sm:$0xff] (!%p189_p2)  }
   0x7   : > { %p217_p3 = scmp.lt.s32.totalorder (!%p189_p2), %s216_s20, 11  ;;  %647 = vmatpush3.bf16.msra.mxu0 (!%p189_p2), %v716_v42  ;;  %650 = vmatprep.mubr.msk.bf16.mxu0 (!%p189_p2), %vm747_vm1, %v746_v43  ;;  %v721_v48 = vld [vmem:[%s922_s3 + $0x18] sm:$0xff] (!%p189_p2)   ;;  %v722_v49 = vld [vmem:[%s922_s3 + $0x20] sm:$0xff] (!%p189_p2)   ;;  %v723_v50 = vld [vmem:[%s922_s3 + $0x28] sm:$0xff] (!%p189_p2)  }
   0x8   : > { %648 = vmatprep.subr.bf16.mxu0 (!%p189_p2), %v746_v43  ;;  %682 = vmatprep.mubr.msk.bf16.mxu1 (!%p189_p2), %vm747_vm1, %v746_v43 }
   0x9   : > { %698 = vmatpush3.bf16.msra.mxu1 (!%p189_p2), %v718_v45 }
   0xa   : > { %691 = vmatprep.subr.bf16.mxu1 (!%p189_p2), %v746_v43 }
   0xb   : > { %649 = vmatpush3.bf16.msra.mxu0 (!%p189_p2), %v717_v44 }
   0xc   : > { %662 = vmatprep.subr.bf16.mxu0 (!%p189_p2), %v746_v43 }
   0xd   : > { %s926_s20 = smov (!%p217_p3, %s216_s20), 11  ;;  %699 = vmatpush3.bf16.msra.mxu1 %v719_v46 }
   0xe   : > { %s611_s21 = sshll.u32 %s926_s20, 3  ;;  %692 = vmatprep.subr.bf16.mxu1 %v746_v43 }
   0xf   : > { %s220_s24 = scalar_lea.vmem %s919_s0, %s611_s21  ;;  %s226_s29 = scalar_lea.vmem %s924_s5, %s611_s21 }
  0x10   : > { %v229_v0 = vld [vmem:[%s220_s24] sm:$0xff]  ;;  %v231_v1 = vld [vmem:[%s220_s24 + $0x10] sm:$0xff]  ;;  %v230_v2 = vld [vmem:[%s220_s24 + $0x8] sm:$0xff] }
  0x11   : > { %v236_v3 = vsel %vm235_vm0, %v229_v0, 0.0  ;;  %v242_v4 = vsel %vm235_vm0, %v231_v1, 0.0  ;;  %v232_v5 = vld [vmem:[%s220_s24 + $0x18] sm:$0xff]  ;;  %v239_v6 = vsel %vm235_vm0, %v230_v2, 0.0  ;;  %v233_v8 = vld [vmem:[%s220_s24 + $0x20] sm:$0xff]  ;;  %v234_v9 = vld [vmem:[%s220_s24 + $0x28] sm:$0xff]  ;;  %700 = vmatpush3.bf16.msra.mxu1 %v720_v47 }
  0x12   : > { %237 = vadd.xlane.f32.xlu0 %v236_v3  ;;  %243 = vadd.xlane.f32.xlu1 %v242_v4  ;;  %v245_v7 = vsel %vm235_vm0, %v232_v5, 0.0  ;;  %v248_v10 = vsel %vm235_vm0, %v233_v8, 0.0  ;;  %v251_v11 = vsel %vm235_vm0, %v234_v9, 0.0 }
  0x13   : > { %693 = vmatprep.subr.bf16.mxu1 %v746_v43 }
  0x15   : > { %701 = vmatpush3.bf16.msra.mxu1 %v721_v48 }
  0x16   : > { %240 = vadd.xlane.f32.xlu0 %v239_v6  ;;  %246 = vadd.xlane.f32.xlu1 %v245_v7 }
  0x17   : > { %694 = vmatprep.subr.bf16.mxu1 %v746_v43 }
  0x19   : > { %702 = vmatpush3.bf16.msra.mxu1 %v722_v49 }
  0x1a   : > { %249 = vadd.xlane.f32.xlu0 %v248_v10  ;;  %252 = vadd.xlane.f32.xlu1 %v251_v11 }
  0x1b   : > { %695 = vmatprep.subr.bf16.mxu1 %v746_v43 }
  0x1d   : > { %703 = vmatpush3.bf16.msra.mxu1 %v723_v50 }
  0x1e   : > { %696 = vmatprep.subr.bf16.mxu1 %v746_v43 }
  0x9f   : > { %v238_v12 = vpop.xlane.xlu0 %237  ;;  %v244_v13 = vpop.xlane.xlu1 %243 }
  0xa0   : > { %v255_v14 = vmul.f32 0.03125, %v238_v12  ;;  %v257_v15 = vmul.f32 0.03125, %v244_v13 }
  0xa2   : > { %v800_v16 = vsub.f32 %v229_v0, %v255_v14  ;;  %v802_v17 = vsub.f32 %v231_v1, %v257_v15 }
  0xa3   : > { %v241_v18 = vpop.xlane.xlu0 %240  ;;  %v247_v19 = vpop.xlane.xlu1 %246 }
  0xa4   : > { %v256_v20 = vmul.f32 0.03125, %v241_v18  ;;  %v258_v21 = vmul.f32 0.03125, %v247_v19  ;;  %v267_v22 = vmul.f32 %v800_v16, %v800_v16  ;;  %v269_v23 = vmul.f32 %v802_v17, %v802_v17 }
  0xa6   : > { %v808_v24 = vsub.f32 %v230_v2, %v256_v20  ;;  %v810_v25 = vsub.f32 %v232_v5, %v258_v21  ;;  %v273_v26 = vsel %vm235_vm0, %v267_v22, 0.0  ;;  %v279_v29 = vsel %vm235_vm0, %v269_v23, 0.0  ;;  %v724_v20 = vld [vmem:[%s922_s3 + $0x30] sm:$0xff]   ;;  %v725_v21 = vld [vmem:[%s922_s3 + $0x38] sm:$0xff]   ;;  %v613_v22 = vld [vmem:[%s921_s2] ss:$0 sm:$0xff] }
  0xa7   : > { %274 = vadd.xlane.f32.xlu0 %v273_v26  ;;  %v250_v27 = vpop.xlane.xlu0 %249  ;;  %v253_v28 = vpop.xlane.xlu1 %252  ;;  %704 = vmatpush3.bf16.msra.mxu1 %v724_v20 }
  0xa8   : > { %v259_v30 = vmul.f32 0.03125, %v250_v27  ;;  %v260_v31 = vmul.f32 0.03125, %v253_v28  ;;  %v268_v32 = vmul.f32 %v808_v24, %v808_v24  ;;  %v270_v33 = vmul.f32 %v810_v25, %v810_v25  ;;  %697 = vmatprep.subr.bf16.mxu1 %v746_v43 }
  0xaa   : > { %v818_v34 = vsub.f32 %v233_v8, %v259_v30  ;;  %v820_v35 = vsub.f32 %v234_v9, %v260_v31  ;;  %v276_v36 = vsel %vm235_vm0, %v268_v32, 0.0  ;;  %v282_v37 = vsel %vm235_vm0, %v270_v33, 0.0 }
  0xab   : > { %280 = vadd.xlane.f32.xlu0 %v279_v29  ;;  %277 = vadd.xlane.f32.xlu1 %v276_v36 }
  0xac   : > { %v271_v38 = vmul.f32 %v818_v34, %v818_v34  ;;  %v272_v39 = vmul.f32 %v820_v35, %v820_v35  ;;  %705 = vmatpush3.bf16.msra.mxu1 %v725_v21 }
  0xae   : > { %v285_v40 = vsel %vm235_vm0, %v271_v38, 0.0  ;;  %v288_v41 = vsel %vm235_vm0, %v272_v39, 0.0 }
  0xaf   : > { %283 = vadd.xlane.f32.xlu1 %v282_v37  ;;  %286 = vadd.xlane.f32.xlu0 %v285_v40 }
  0xb3   : > { %289 = vadd.xlane.f32.xlu1 %v288_v41 }
 0x134   : > { %v275_v51 = vpop.xlane.xlu0 %274 }
 0x135   : > { %v291_v52 = vmul.f32 0.03125, %v275_v51  ;;  %v619_v51 = vld [vmem:[%s923_s4] ss:$0 sm:$0xff] }
 0x137   : > { %v297_v53 = vadd.f32 1e-05, %v291_v52 }
 0x138   : > { %v278_v54 = vpop.xlane.xlu1 %277  ;;  %v281_v55 = vpop.xlane.xlu0 %280 }
 0x139   : > { %v292_v56 = vmul.f32 0.03125, %v278_v54  ;;  %726 = vrsqrt.f32 %v297_v53  ;;  %v293_v58 = vmul.f32 0.03125, %v281_v55 }
 0x13b   : > { %v298_v57 = vadd.f32 1e-05, %v292_v56  ;;  %v299_v61 = vadd.f32 1e-05, %v293_v58 }
 0x13c   : > { %v284_v59 = vpop.xlane.xlu1 %283  ;;  %v287_v63 = vpop.xlane.xlu0 %286 }
 0x13d   : > { %728 = vrsqrt.f32 %v298_v57  ;;  %v294_v60 = vmul.f32 0.03125, %v284_v59  ;;  %v295_v2 = vmul.f32 0.03125, %v287_v63 }
 0x13f   : > { %v300_v62 = vadd.f32 1e-05, %v294_v60  ;;  %v301_v6 = vadd.f32 1e-05, %v295_v2 }
 0x140   : > { %v290_v0 = vpop.xlane.xlu1 %289 }
 0x141   : > { %730 = vrsqrt.f32 %v300_v62  ;;  %v296_v1 = vmul.f32 0.03125, %v290_v0 }
 0x142   : > { %732 = vrsqrt.f32 %v299_v61 }
 0x143   : > { %v727_v3 = vpop.eup %726  ;;  %v302_v4 = vadd.f32 1e-05, %v296_v1 }
 0x144   : > { %v309_v7 = vmul.f32 %v727_v3, %v800_v16 }
 0x145   : > { %734 = vrsqrt.f32 %v302_v4 }
 0x146   : > { %736 = vrsqrt.f32 %v301_v6 }
 0x147   : > { %v729_v5 = vpop.eup %728 }
 0x148   : > { %v310_v8 = vmul.f32 %v729_v5, %v808_v24 }
 0x14a   : > { %v315_v9 = vpack.c.bf16 %v310_v8, %v309_v7 }
 0x14b   : > { %v731_v10 = vpop.eup %730 }
 0x14c   : > { %651 = vmatmul.mubr.msk.bf16.vlgmr.msra.gmra.mrb[0].mxu0 %vm235_vm0, %v315_v9  ;;  %v733_v11 = vpop.eup %732  ;;  %v312_v12 = vmul.f32 %v731_v10, %v810_v25 }
 0x14d   : > { %654 = vmatprep.mubr.msk.bf16.mxu0 %vm747_vm1, %v746_v43  ;;  %663 = vmatpush3.bf16.msra.mxu0 %v718_v45  ;;  %v311_v13 = vmul.f32 %v733_v11, %v802_v17 }
 0x14e   : > { %664 = vmatprep.subr.bf16.mxu0 %v746_v43 }
 0x14f   : > { %v316_v14 = vpack.c.bf16 %v312_v12, %v311_v13  ;;  %v735_v15 = vpop.eup %734 }
 0x150   : > { %v737_v16 = vpop.eup %736  ;;  %v314_v18 = vmul.f32 %v735_v15, %v820_v35 }
 0x151   : > { %665 = vmatpush3.bf16.msra.mxu0 %v719_v46  ;;  %v313_v19 = vmul.f32 %v737_v16, %v818_v34 }
 0x152   : > { %666 = vmatprep.subr.bf16.mxu0 %v746_v43 }
 0x153   : > { %v317_v17 = vpack.c.bf16 %v314_v18, %v313_v19 }
 0x154   : > { %655 = vmatmul.mubr.msk.bf16.gmra.mrb[4].mxu0 %vm235_vm0, %v316_v14 }
 0x155   : > { %658 = vmatprep.mubr.msk.bf16.mxu0 %vm747_vm1, %v746_v43  ;;  %667 = vmatpush3.bf16.msra.mxu0 %v720_v47 }
 0x156   : > { %668 = vmatprep.subr.bf16.mxu0 %v746_v43 }
 0x159   : > { %669 = vmatpush3.bf16.msra.mxu0 %v721_v48 }
 0x15a   : > { %670 = vmatprep.subr.bf16.mxu0 %v746_v43 }
 0x15c   : > { %659 = vmatmul.mubr.msk.bf16.gmra.mrb[8].mxu0 %vm235_vm0, %v317_v17 }
 0x15d   : > { %671 = vmatpush3.bf16.msra.mxu0 %v722_v49  ;;  %678 = vmatprep.mubr.msk.bf16.mxu0 %vm747_vm1, %v746_v43 }
 0x15e   : > { %672 = vmatprep.subr.bf16.mxu0 %v746_v43 }
 0x161   : > { %673 = vmatpush3.bf16.msra.mxu0 %v723_v50 }
 0x162   : > { %674 = vmatprep.subr.bf16.mxu0 %v746_v43 }
 0x165   : > { %675 = vmatpush3.bf16.msra.mxu0 %v724_v20 }
 0x166   : > { %676 = vmatprep.subr.bf16.mxu0 %v746_v43 }
 0x169   : > { %677 = vmatpush3.bf16.msra.mxu0 %v725_v21 }
 0x21f   : > { %v384_v23 = vpop.f32.mrb[0].mxu0 }
 0x220   : > { %v385_v24 = vadd.f32 %v613_v22, %v384_v23  ;;  %v652_v25 = vpop.f32.mrb[1].mxu0 }
 0x221   : > { %v387_v26 = vpop.f32.mrb[2].mxu0 }
 0x222   : > { %v388_v27 = vadd.f32 %v613_v22, %v387_v26  ;;  %v653_v28 = vpop.f32.mrb[3].mxu0  ;;  %v407_v29 = vmax.f32 %v385_v24, 0.0 }
 0x224   : > { %v408_v30 = vmax.f32 %v388_v27, 0.0 }
 0x226   : > { %v413_v31 = vpack.c.bf16 %v408_v30, %v407_v29 }
 0x227   : > { %v392_v32 = vpop.f32.mrb[4].mxu0 }
 0x228   : > { %v393_v33 = vadd.f32 %v613_v22, %v392_v32  ;;  %v656_v34 = vpop.f32.mrb[5].mxu0  ;;  %679 = vmatmul.mubr.bf16.vlgmr.msra.gmra.mrb[12].mxu0 %v413_v31 }
 0x229   : > { %v395_v35 = vpop.f32.mrb[6].mxu0 }
 0x22a   : > { %v396_v36 = vadd.f32 %v613_v22, %v395_v35  ;;  %v657_v37 = vpop.f32.mrb[7].mxu0  ;;  %v409_v38 = vmax.f32 %v393_v33, 0.0 }
 0x22c   : > { %v410_v39 = vmax.f32 %v396_v36, 0.0 }
 0x22e   : > { %v414_v40 = vpack.c.bf16 %v410_v39, %v409_v38 }
 0x22f   : > { %v400_v41 = vpop.f32.mrb[8].mxu0 }
 0x230   : > { %v401_v42 = vadd.f32 %v613_v22, %v400_v41  ;;  %v660_v44 = vpop.f32.mrb[9].mxu0  ;;  %683 = vmatmul.mubr.bf16.vlgmr.msra.gmra.mrb[0].mxu1 %v414_v40 }
 0x231   : > { %v403_v45 = vpop.f32.mrb[10].mxu0  ;;  %686 = vmatprep.mubr.msk.bf16.mxu1 %vm747_vm1, %v746_v43 }
 0x232   : > { %v404_v46 = vadd.f32 %v613_v22, %v403_v45  ;;  %v661_v47 = vpop.f32.mrb[11].mxu0  ;;  %v411_v48 = vmax.f32 %v401_v42, 0.0 }
 0x234   : > { %v412_v49 = vmax.f32 %v404_v46, 0.0 }
 0x236   : > { %v415_v50 = vpack.c.bf16 %v412_v49, %v411_v48 }
 0x238   : > { %687 = vmatmul.mubr.bf16.gmra.mrb[4].mxu1 %v415_v50 }
 0x2fb   : > { %v521_v52 = vpop.f32.mrb[12].mxu0 }
 0x2fc   : > { %v522_v53 = vadd.f32 %v619_v51, %v521_v52  ;;  %v680_v54 = vpop.f32.mrb[13].mxu0 }
 0x2fd   : > { %v524_v55 = vpop.f32.mrb[14].mxu0 }
 0x2fe   : > { %544 = vst.msk [vmem:[%s226_s29] sm:$0xff] %vm235_vm0, %v522_v53  ;;  %v525_v43 = vadd.f32 %v619_v51, %v524_v55  ;;  %v681_v56 = vpop.f32.mrb[15].mxu0 }
 0x300   : > { %545 = vst.msk [vmem:[%s226_s29 + $0x8] sm:$0xff] %vm235_vm0, %v525_v43 }
 0x303   : > { %v529_v57 = vpop.f32.mrb[0].mxu1 }
 0x304   : > { %v530_v58 = vadd.f32 %v619_v51, %v529_v57  ;;  %v684_v59 = vpop.f32.mrb[1].mxu1 }
 0x305   : > { %v532_v60 = vpop.f32.mrb[2].mxu1 }
 0x306   : > { %546 = vst.msk [vmem:[%s226_s29 + $0x10] sm:$0xff] %vm235_vm0, %v530_v58  ;;  %v533_v61 = vadd.f32 %v619_v51, %v532_v60  ;;  %v685_v62 = vpop.f32.mrb[3].mxu1 }
 0x308   : > { %547 = vst.msk [vmem:[%s226_s29 + $0x18] sm:$0xff] %vm235_vm0, %v533_v61 }
 0x30b   : > { %v537_v63 = vpop.f32.mrb[4].mxu1 }
 0x30c   : > { %v538_v0 = vadd.f32 %v619_v51, %v537_v63  ;;  %v688_v1 = vpop.f32.mrb[5].mxu1 }
 0x30d   : > { %v540_v2 = vpop.f32.mrb[6].mxu1 }
 0x30e   : > { %548 = vst.msk [vmem:[%s226_s29 + $0x20] sm:$0xff] %vm235_vm0, %v538_v0  ;;  %v541_v3 = vadd.f32 %v619_v51, %v540_v2  ;;  %v689_v4 = vpop.f32.mrb[7].mxu1 }
 0x310   : > { %549 = vst.msk [vmem:[%s226_s29 + $0x28] sm:$0xff] %vm235_vm0, %v541_v3 }
 0x311 PF: > { %s15_s18 = sadd.s32 1, %s744_s18  }
 0x312   : > { %p12_p4 = scmp.ge.s32.totalorder %s15_s18, 4  }
 0x314   :  { %14 = sbr.rel (!%p12_p4) target bundleno = 1 (0x1), region = 70 }

</bundles_post_ra>
